<compile_context>
chip_gen: v5e
topology: v5e:2x2
jax: 0.10.0
libtpu: 0.0.40
codegen_flags: <defaults>
</compile_context>

<pallas_src>
import jax
import jax.numpy as jnp
from jax import lax
from jax.experimental import pallas as pl
from jax.experimental.pallas import tpu as pltpu


# ----------------------------------------------------------------------------
# Generation detection (v7x: 2 TensorCores/chip, 64 MiB VMEM/TC).
# ----------------------------------------------------------------------------
def _is_v7x_chip():
    try:
        kind = jax.devices()[0].device_kind.lower()
    except Exception:
        return False
    return ("v7" in kind) or ("7x" in kind)


_IS_V7X = _is_v7x_chip()


def _largest_divisor(n, cap, step=8):
    """Largest multiple-of-`step` divisor of n that is <= cap (else n itself)."""
    best = None
    for cand in range(step, min(cap, n) + 1, step):
        if n % cand == 0:
            best = cand
    return best if best is not None else n


def _buffered_spec(block_shape, index_map, buffer_count):
    """BlockSpec with explicit multi-buffering; falls back if unsupported."""
    try:
        return pl.BlockSpec(block_shape, index_map,
                            pipeline_mode=pl.Buffered(buffer_count))
    except Exception:
        return pl.BlockSpec(block_shape, index_map)


# ----------------------------------------------------------------------------
# Tiled matmul kernel (MXU).  Optional fused clean-FID preprocessing on the A
# operand and fused ReLU on the output.  Specialized on the k-grid size.
# ----------------------------------------------------------------------------
def _make_matmul_kernel(relu: bool, preprocess: bool, single_k: bool):
    def load_a(a_ref):
        a = a_ref[...]
        if preprocess:
            # clean-FID preprocessing fused into the MXU operand path:
            # (x - 128) / 128, then bf16 for the MXU (accumulation stays f32).
            a = (a.astype(jnp.float32) - 128.0) * (1.0 / 128.0)
            a = a.astype(jnp.bfloat16)
        return a

    if single_k:
        # K//tk == 1: no zero-init, no read-modify-write on the output tile.
        def kernel(a_ref, b_ref, o_ref):
            acc = jnp.dot(load_a(a_ref), b_ref[...],
                          preferred_element_type=jnp.float32)
            if relu:
                acc = jnp.maximum(acc, 0.0)
            o_ref[...] = acc

        return kernel

    def kernel(a_ref, b_ref, o_ref):
        k = pl.program_id(2)

        @pl.when(k == 0)
        def _():
            o_ref[...] = jnp.zeros_like(o_ref)

        o_ref[...] += jnp.dot(load_a(a_ref), b_ref[...],
                              preferred_element_type=jnp.float32)

        if relu:
            @pl.when(k == pl.num_programs(2) - 1)
            def _():
                o_ref[...] = jnp.maximum(o_ref[...], 0.0)

    return kernel


def pallas_matmul(a, b, *, relu=False, preprocess=False, tm=None, tn=None, tk=None):
    M, K = a.shape
    K2, N = b.shape
    assert K == K2, (a.shape, b.shape)
    tm = _largest_divisor(M, 256) if tm is None else tm
    tn = _largest_divisor(N, 256, step=128) if tn is None else tn
    # Cap tk (~512) so the k-varying blocks stay small enough to multi-buffer
    # within default scoped-VMEM limits even at real backbone K (3*299*299).
    tk = _largest_divisor(K, 512, step=128) if tk is None else tk
    assert M % tm == 0 and N % tn == 0 and K % tk == 0
    grid_k = K // tk

    if grid_k == 1:
        in_specs = [
            pl.BlockSpec((tm, tk), lambda i, j, k: (i, k)),
            pl.BlockSpec((tk, tn), lambda i, j, k: (k, j)),
        ]
    else:
        # k-varying inputs: explicit double-buffering so DMA hides behind MXU.
        in_specs = [
            _buffered_spec((tm, tk), lambda i, j, k: (i, k), 2),
            _buffered_spec((tk, tn), lambda i, j, k: (k, j), 2),
        ]

    return pl.pallas_call(
        _make_matmul_kernel(relu, preprocess, grid_k == 1),
        out_shape=jax.ShapeDtypeStruct((M, N), jnp.float32),
        grid_spec=pltpu.PrefetchScalarGridSpec(
            num_scalar_prefetch=0,
            grid=(M // tm, N // tn, grid_k),
            in_specs=in_specs,
            out_specs=pl.BlockSpec((tm, tn), lambda i, j, k: (i, j)),
        ),
        compiler_params=pltpu.CompilerParams(
            dimension_semantics=("parallel", "parallel", "arbitrary")
        ),
    )(a, b)


# ----------------------------------------------------------------------------
# Feature statistics (grouped): column sums (XLU sublane reduce) and the gram
# matrix X^T X (dot_general contracting dim 0) accumulated directly into the
# resident output blocks.  mu / cov (np.mean + np.cov rowvar=False, ddof=1)
# are recovered in glue.
# ----------------------------------------------------------------------------
def _stats_kernel(x_ref, sum_ref, gram_ref):
    @pl.when(pl.program_id(2) == 0)
    def _():
        sum_ref[...] = jnp.zeros_like(sum_ref)
        gram_ref[...] = jnp.zeros_like(gram_ref)

    x = x_ref[...]
    # Column sums on the XLU (sublane reduce) — keeps the MXU/vex slot for the
    # gram matmul (matters on v5e; noise elsewhere).
    sum_ref[...] += jnp.sum(x, axis=0, keepdims=True)
    # gram += x^T x, contracting dim 0 of both operands (no x.T materialization).
    # TODO(synk): confirm in the Mosaic dump this lowers to a transposed MXU
    # feed rather than a per-step vxpose of the tile.
    gram_ref[...] += lax.dot_general(
        x, x,
        dimension_numbers=(((0,), (0,)), ((), ())),
        preferred_element_type=jnp.float32,
    )


def _pick_row_tile(n, cap):
    return _largest_divisor(n, cap, step=8)


def pallas_feature_stats(feats):
    """feats: (N, D) or (G, N, D) float32.
    Returns mu (.., D) and cov (.., D, D) with ddof=1 (np.cov rowvar=False)."""
    squeeze = feats.ndim == 2
    if squeeze:
        feats = feats[None]
    G, N, D = feats.shape
    assert N % 8 == 0 and D % 128 == 0 and N >= 2

    # Generation-aware row tile: v7x keeps 256 (64 MiB/TC with the resident
    # gram); v5e/v6e (128 MiB VMEM) go bigger to cut per-step overhead.
    cap = 256 if _IS_V7X else 512
    tn = _pick_row_tile(N, cap)
    steps_total = N // tn
    # Intra-group 2-way "parallel" sample split only on v7x (2 TCs) and only
    # when the group axis doesn't already provide parallelism; on single-TC
    # v5e/v6e it would just double the gram HBM writeback.
    num_splits = 2 if (_IS_V7X and G == 1 and steps_total >= 2
                       and steps_total % 2 == 0) else 1
    steps = steps_total // num_splits

    colsum, gram = pl.pallas_call(
        _stats_kernel,
        out_shape=(
            jax.ShapeDtypeStruct((G * num_splits, 1, D), jnp.float32),
            jax.ShapeDtypeStruct((G * num_splits, D, D), jnp.float32),
        ),
        grid_spec=pltpu.PrefetchScalarGridSpec(
            num_scalar_prefetch=0,
            grid=(G, num_splits, steps),
            in_specs=[
                pl.BlockSpec((None, tn, D),
                             lambda g, s, k: (g, s * steps + k, 0)),
            ],
            out_specs=[
                pl.BlockSpec((None, 1, D),
                             lambda g, s, k: (g * num_splits + s, 0, 0)),
                pl.BlockSpec((None, D, D),
                             lambda g, s, k: (g * num_splits + s, 0, 0)),
            ],
        ),
        compiler_params=pltpu.CompilerParams(
            dimension_semantics=("parallel", "parallel", "arbitrary"),
            # Resident (D,D) f32 gram + multi-buffered input tiles exceed the
            # default scoped limit at D=2048; raise it per-generation.
            vmem_limit_bytes=(48 << 20) if _IS_V7X else (64 << 20),
        ),
    )(feats)

    colsum = colsum.reshape(G, num_splits, D).sum(axis=1)
    gram = gram.reshape(G, num_splits, D, D).sum(axis=1)
    mu = colsum / N
    # TODO(synk): single-pass (gram - N*mu*mu^T) can lose precision for large
    # feature magnitudes with a real backbone; center features before the gram
    # if that ever matters.
    cov = (gram - N * (mu[:, :, None] * mu[:, None, :])) / (N - 1)
    if squeeze:
        return mu[0], cov[0]
    return mu, cov


# ----------------------------------------------------------------------------
# Fréchet distance: ||mu1 - mu2||^2 + Tr(C1 + C2 - 2*sqrt(C1 C2)).
# Tr(sqrtm(C1 C2)) is computed as Tr(sqrtm(C1^1/2 C2 C1^1/2)) via eigh (equal
# for PSD matrices).  The D×D matmul chain is one fused VMEM-resident kernel
# for small D, and tiled MXU matmuls for real FID dims (fits v7x 64 MiB/TC).
# ----------------------------------------------------------------------------
def _frechet_chain_kernel(evecs_ref, sqev_ref, sigma2_ref, m_ref):
    evecs = evecs_ref[...]
    scaled = evecs * sqev_ref[...]                        # (D, D) * (1, D)
    # s1_half = (evecs * sqrt(evals)) @ evecs^T — transpose folded into the dot.
    s1_half = lax.dot_general(
        scaled, evecs,
        dimension_numbers=(((1,), (1,)), ((), ())),
        preferred_element_type=jnp.float32,
    )
    t = jnp.dot(sigma2_ref[...], s1_half, preferred_element_type=jnp.float32)
    m_ref[...] = jnp.dot(s1_half, t, preferred_element_type=jnp.float32)


def _frechet_chain(evecs1, sqrt_evals1, sigma2):
    D = evecs1.shape[0]
    # Fused path: ~6 DxD f32 buffers live in VMEM — only when that fits every
    # generation comfortably (v7x: 64 MiB/TC, default scoped limits 16-32 MiB).
    if 6 * D * D * 4 <= (12 << 20):
        return pl.pallas_call(
            _frechet_chain_kernel,
            out_shape=jax.ShapeDtypeStruct((D, D), jnp.float32),
        )(evecs1, sqrt_evals1.reshape(1, D), sigma2)
    # Large-D fallback (real FID D=2048): tiled MXU matmuls.
    scaled = evecs1 * sqrt_evals1[None, :]
    s1_half = pallas_matmul(scaled, evecs1.T)
    t = pallas_matmul(sigma2, s1_half)
    return pallas_matmul(s1_half, t)


def pallas_frechet_distance(mu1, sigma1, mu2, sigma2, eps=1e-6):
    # TODO(synk): the reference adds eps*I only when sqrtm goes singular; here
    # eigenvalue clipping provides the equivalent stabilization.
    del eps
    diff = mu1 - mu2

    # TODO(synk): eigendecomposition (scipy.linalg.sqrtm equivalent) has no
    # Pallas primitive; it stays in jnp.linalg.eigh.  The surrounding matmul
    # chain runs in Pallas.
    evals1, evecs1 = jnp.linalg.eigh(sigma1)
    sqrt_evals1 = jnp.sqrt(jnp.clip(evals1, 0.0, None))

    m = _frechet_chain(evecs1, sqrt_evals1, sigma2)
    m = 0.5 * (m + m.T)  # symmetrize against float error
    evals_m = jnp.linalg.eigh(m)[0]
    tr_covmean = jnp.sum(jnp.sqrt(jnp.clip(evals_m, 0.0, None)))

    return (
        jnp.dot(diff, diff)
        + jnp.trace(sigma1)
        + jnp.trace(sigma2)
        - 2.0 * tr_covmean
    )


# ----------------------------------------------------------------------------
# FID module (forward pass only, distance_type='frechet', mode='clean').
# ----------------------------------------------------------------------------
class FIDPallas:
    def __init__(self, dims: int = 128, in_chw=(3, 16, 16), seed: int = 0):
        c, h, w = in_chw
        key = jax.random.PRNGKey(seed)
        # Deterministic synthetic backbone weights (stand-in for InceptionV3),
        # stored in bf16 — MXU inputs are bf16, accumulation stays f32.
        w_f32 = jax.random.normal(key, (c * h * w, dims), jnp.float32) / jnp.sqrt(
            float(c * h * w)
        )
        self.w = w_f32.astype(jnp.bfloat16)
        self.dims = dims

    def extract_features(self, imgs_nchw):
        n = imgs_nchw.shape[0]
        x = imgs_nchw.reshape(n, -1).astype(jnp.float32)  # NCHW -> (N, C*H*W)
        # clean-FID preprocessing (x-128)/128 + bf16 cast are fused into the
        # matmul kernel's A-operand path — the matmul is the only image pass.
        return pallas_matmul(x, self.w, relu=True, preprocess=True)

    def forward(self, imgs1, imgs2, distance_type: str = "frechet"):
        if distance_type != "frechet":
            # TODO(synk): KID / MMD branches of FID.forward are not implemented.
            raise ValueError(f"Invalid distance type: {distance_type}")

        if imgs1.shape == imgs2.shape:
            # Batch both "folders" through one feature-extraction matmul and
            # one grouped stats kernel (halves pallas_call launches; the group
            # axis shards across v7x's two TensorCores).
            n = imgs1.shape[0]
            x = jnp.concatenate(
                [imgs1.reshape(n, -1), imgs2.reshape(n, -1)], axis=0
            ).astype(jnp.float32)
            feats = pallas_matmul(x, self.w, relu=True, preprocess=True)
            feats = feats.reshape(2, n, self.dims)
            mu, cov = pallas_feature_stats(feats)
            return pallas_frechet_distance(mu[0], cov[0], mu[1], cov[1])

        feats1 = self.extract_features(imgs1)
        feats2 = self.extract_features(imgs2)
        mu1, sig1 = pallas_feature_stats(feats1)
        mu2, sig2 = pallas_feature_stats(feats2)
        return pallas_frechet_distance(mu1, sig1, mu2, sig2)

    __call__ = forward


if __name__ == "__main__":
    key = jax.random.PRNGKey(0)
    k1, k2 = jax.random.split(key)

    N, C, H, W = 32, 3, 16, 16  # two small "folders" of 32 images each
    imgs1 = jax.random.uniform(k1, (N, C, H, W), jnp.float32, 0.0, 255.0)
    imgs2 = jax.random.uniform(k2, (N, C, H, W), jnp.float32, 0.0, 255.0)

    fid = FIDPallas(dims=128, in_chw=(C, H, W), seed=0)
    score = fid(imgs1, imgs2)
    score = jax.block_until_ready(score)
    assert jnp.isfinite(score)
    print("KERNEL_OK")
</pallas_src>

<mosaic_0001>
module attributes {stable_mosaic.version = 11 : i64} {
  func.func @kernel(%arg0: i32, %arg1: i32, %arg2: i32, %arg3: memref<64x384xf32, #tpu.memory_space<vmem>>, %arg4: memref<384x128xbf16, #tpu.memory_space<vmem>>, %arg5: memref<64x128xf32, #tpu.memory_space<vmem>>) attributes {dimension_semantics = [#tpu.dimension_semantics<parallel>, #tpu.dimension_semantics<parallel>, #tpu.dimension_semantics<arbitrary>], iteration_bounds = array<i64: 1, 1, 2>, scalar_prefetch = 0 : i64, scratch_operands = 0 : i64, tpu.core_type = #tpu.core_type<tc>, window_params = [{pipeline_mode = #tpu.pipeline_mode<double_buffered>, transform_indices = @transform_0, window_bounds = array<i64: 64, 384>}, {pipeline_mode = #tpu.pipeline_mode<double_buffered>, transform_indices = @transform_1, window_bounds = array<i64: 384, 128>}, {transform_indices = @transform_2, window_bounds = array<i64: 64, 128>}]} {
    %c0_i32 = arith.constant 0 : i32
    %0 = arith.cmpi eq, %arg2, %c0_i32 : i32
    %1 = arith.extui %0 : i1 to i32
    %c0_i32_0 = arith.constant 0 : i32
    %2 = arith.cmpi ne, %1, %c0_i32_0 : i32
    scf.if %2 {
      %cst_11 = arith.constant 0.000000e+00 : f32
      %17 = vector.broadcast %cst_11 : f32 to vector<64x128xf32>
      %c0_12 = arith.constant 0 : index
      %c0_13 = arith.constant 0 : index
      %18 = vector.load %arg5[%c0_12, %c0_13] : memref<64x128xf32, #tpu.memory_space<vmem>>, vector<64x128xf32>
      tpu.vector_store %arg5[%c0_12, %c0_13], %17 {strides = array<i32>} : memref<64x128xf32, #tpu.memory_space<vmem>>, vector<64x128xf32>,
    } else {
    }
    %c0 = arith.constant 0 : index
    %c0_1 = arith.constant 0 : index
    %3 = vector.load %arg5[%c0, %c0_1] : memref<64x128xf32, #tpu.memory_space<vmem>>, vector<64x128xf32>
    %c0_2 = arith.constant 0 : index
    %c0_3 = arith.constant 0 : index
    %4 = vector.load %arg3[%c0_2, %c0_3] : memref<64x384xf32, #tpu.memory_space<vmem>>, vector<64x384xf32>
    %cst = arith.constant 1.280000e+02 : f32
    %5 = vector.broadcast %cst : f32 to vector<64x384xf32>
    %6 = arith.subf %4, %5 : vector<64x384xf32>
    %cst_4 = arith.constant 7.812500e-03 : f32
    %7 = vector.broadcast %cst_4 : f32 to vector<64x384xf32>
    %8 = arith.mulf %6, %7 : vector<64x384xf32>
    %9 = arith.truncf %8 : vector<64x384xf32> to vector<64x384xbf16>
    %c0_5 = arith.constant 0 : index
    %c0_6 = arith.constant 0 : index
    %10 = vector.load %arg4[%c0_5, %c0_6] : memref<384x128xbf16, #tpu.memory_space<vmem>>, vector<384x128xbf16>
    %cst_7 = arith.constant dense<0.000000e+00> : vector<64x128xf32>
    %11 = tpu.matmul %9, %10, %cst_7 {dimension_numbers = #tpu.dot_dimension_numbers<[1], [0], [0], [1], [0, 0, 1, 1], [], []>} : vector<64x384xbf16>, vector<384x128xbf16>, vector<64x128xf32> -> vector<64x128xf32>
    %12 = arith.addf %3, %11 : vector<64x128xf32>
    %c0_8 = arith.constant 0 : index
    %c0_9 = arith.constant 0 : index
    %13 = vector.load %arg5[%c0_8, %c0_9] : memref<64x128xf32, #tpu.memory_space<vmem>>, vector<64x128xf32>
    tpu.vector_store %arg5[%c0_8, %c0_9], %12 {strides = array<i32>} : memref<64x128xf32, #tpu.memory_space<vmem>>, vector<64x128xf32>,
    %c1_i32 = arith.constant 1 : i32
    %14 = arith.cmpi eq, %arg2, %c1_i32 : i32
    %15 = arith.extui %14 : i1 to i32
    %c0_i32_10 = arith.constant 0 : i32
    %16 = arith.cmpi ne, %15, %c0_i32_10 : i32
    scf.if %16 {
      %c0_11 = arith.constant 0 : index
      %c0_12 = arith.constant 0 : index
      %17 = vector.load %arg5[%c0_11, %c0_12] : memref<64x128xf32, #tpu.memory_space<vmem>>, vector<64x128xf32>
      %cst_13 = arith.constant 0.000000e+00 : f32
      %18 = vector.broadcast %cst_13 : f32 to vector<64x128xf32>
      %19 = arith.maximumf %17, %18 : vector<64x128xf32>
      %c0_14 = arith.constant 0 : index
      %c0_15 = arith.constant 0 : index
      %20 = vector.load %arg5[%c0_14, %c0_15] : memref<64x128xf32, #tpu.memory_space<vmem>>, vector<64x128xf32>
      tpu.vector_store %arg5[%c0_14, %c0_15], %19 {strides = array<i32>} : memref<64x128xf32, #tpu.memory_space<vmem>>, vector<64x128xf32>,
    } else {
    }
    return
  }
  func.func @transform_0(%arg0: i32, %arg1: i32, %arg2: i32) -> (i32, i32) {
    %c0_i32 = arith.constant 0 : i32
    return %arg0, %arg2 : i32, i32
  }
  func.func @transform_1(%arg0: i32, %arg1: i32, %arg2: i32) -> (i32, i32) {
    %c0_i32 = arith.constant 0 : i32
    return %arg2, %arg1 : i32, i32
  }
  func.func @transform_2(%arg0: i32, %arg1: i32, %arg2: i32) -> (i32, i32) {
    %c0_i32 = arith.constant 0 : i32
    return %arg0, %arg1 : i32, i32
  }
}

</mosaic_0001>

<bundles_post_ra>
// kernel: tpu_custom_call.1
= control target key start
LH: loop header
LB: loop body
LE: loop exit
PB: predicated region body
PF: predicated region fallthrough
CT: control target
= control target key end

     0   :  { %7 = vsyncpa [#allocation3], 0  ;;  %s1343_s0 = inlined_call_operand.hbm [shape: f32[64,768], index: 0, kind: input, shape index: {}]   ;;  %s1344_s1 = inlined_call_operand.hbm [shape: bf16[768,128], index: 1, kind: input, shape index: {}]   ;;  %s1345_s2 = inlined_call_operand.hbm [shape: f32[64,128], index: 2, kind: output, shape index: {}]  }
   0x1   :  { %9 = vsyncpa [#allocation3 + $0x1], 0 }
   0x2   :  { %10 = vsyncpa [#allocation6], 0 }
   0x3   :  { %12 = vsyncpa [#allocation6 + $0x1], 0 }
   0x4   :  { %13 = vsyncpa [#allocation4], 0  ;;  %s1184_s9 = smov 0   ;;  %s1186_s10 = smov 0  }
   0x5   :  { %s1188_s11 = smov 0   ;;  %s1190_s12 = smov 0  }
   0x6   :  { %s1192_s13 = smov 0   ;;  %s1194_s14 = smov 0  }
   0x7 LB: > { %s768_s15 = sadd.s32 4294967295, %s1158_s14   ;;  %s31_s16 = sadd.s32 1, %s1154_s13  ;;  %s1158_s14 = sphi %s1194_s14, %s19_s14   ;;  %s1154_s13 = sphi %s1192_s13, %s1352_s13   ;;  %s1150_s12 = sphi %s1190_s12, %s1351_s12   ;;  %s1146_s11 = sphi %s1188_s11, %s1350_s11   ;;  %s1142_s10 = sphi %s1186_s10, %s1349_s10   ;;  %s1138_s9 = sphi %s1184_s9, %s1348_s9  }
   0x8   : > { %p32_p0 = scmp.ge.s32.totalorder %s31_s16, 2  ;;  %s47_s17 = sadd.s32 1, %s1146_s11 }
   0x9   : > { %p54_p1 = scmp.ne.s32.totalorder %s1146_s11, %s1142_s10  ;;  %p55_p2 = scmp.eq.s32.totalorder %s1158_s14, 0 }
   0xa   : > { %s1354_s16 = smov (%p32_p0, %s31_s16), 0  ;;  %p60_p4 = scmp.ne.s32.totalorder %s1142_s10, %s1138_s9 }
   0xb   : > { %p56_p3 = por %p55_p2, %p54_p1  ;;  %s43_s18 = ssub.s32 %s1154_s13, %s1354_s16 }
   0xc   : > { %p61_p5 = scmp.eq.s32.totalorder %s768_s15, 0  ;;  %p45_p6 = scmp.eq.s32.totalorder %s43_s18, 0 }
   0xd   : > { %p952_p8 = scmp.lt.s32.totalorder %s1158_s14, 2  ;;  %s1234_s21 = sand.u32 1, %s1146_s11  }
   0xe   : > { %p1225_p7 = por %p61_p5, %p60_p4  ;;  %s900_s22 = smul.u32 24, %s1154_s13 }
   0xf   : > { %s1231_s20 = scalar_select %p45_p6, %s1146_s11, %s47_s17  }
  0x10   : > { %s934_s23 = smul.u32 192, %s1234_s21  ;;  %s152_s26 = scalar_lea.hbm %s1343_s0, %s900_s22 }
  0x11   : > { %p1241_p9 = pnand %p952_p8, %p56_p3  ;;  %s153_s28 = sshll.u32 %s152_s26, 4  ;;  %s154_s28 = int_to_ptr.hbm [resolvable:$true] %s153_s28 }
  0x12   : > { %s144_s29 = scalar_lea.vmem [#allocation2], %s934_s23  ;;  %p773_p10 = scmp.ge.s32.totalorder %s1158_s14, 1 }
  0x13   : > { %s155_s30 = sshll.u32 %s144_s29, 4  ;;  %s141_s3 = scalar_lea.sflag [#allocation3], %s1234_s21  ;;  %s156_s30 = int_to_ptr.vmem [resolvable:$true] %s155_s30 }
  0x14   : > { %s1160_s4 = smov 768   ;;  %s1161_s5 = smov 384  }
  0x15   : > { %s1162_s6 = smov 24   ;;  %p186_p11 = scmp.lt.s32.totalorder %s1158_s14, 3 }
  0x16   : > { %948 = dma.hbm_to_vmem [thread:$0]  (!%p1241_p9), %s154_s28, 3072, %s156_s30, %s141_s3, %s1160_s4, %s1161_s5, %s1162_s6  }
  0x17   : > { %s901_s7 = smul.u32 192, %s1154_s13  ;;  %p187_p12 = pnand %p773_p10, %p186_p11 }
  0x18   : > { %s169_s8 = scalar_lea.vmem [#allocation5], %s934_s23  ;;  %s166_s25 = scalar_lea.sflag [#allocation6], %s1234_s21 }
  0x19   : > { %s178_s9 = sshll.u32 %s169_s8, 4  ;;  %s175_s22 = scalar_lea.hbm %s1344_s1, %s901_s7  ;;  %s179_s9 = int_to_ptr.vmem [resolvable:$true] %s178_s9 }
  0x1a   : > { %s176_s24 = sshll.u32 %s175_s22, 4  ;;  %s1163_s26 = smov 64   ;;  %s177_s24 = int_to_ptr.hbm [resolvable:$true] %s176_s24 }
  0x1b   : > { %s1164_s29 = smov 4   ;;  %190 = sbr.rel (%p187_p12) target bundleno = 296 (0x128), region = 28 }
  0x1c   : > { %951 = dma.hbm_to_vmem [thread:$0]  (!%p1241_p9), %s177_s24, 3072, %s179_s9, %s166_s25, %s1163_s26, %s1163_s26, %s1164_s29  }
  0x1d   : > { %s192_s28 = sand.u32 (!%p187_p12), 1, %s1142_s10  }
  0x1e   : > { %s936_s30 = smul.u32 (!%p187_p12), 192, %s192_s28  ;;  %s193_s3 = scalar_lea.sflag (!%p187_p12), [#allocation3], %s192_s28 }
  0x20   : > { %s1258_s23 = scalar_lea.vmem [#allocation2], %s936_s30 }
  0x21   : > { %1125 = dma.done.wait (%p1225_p7), %s193_s3, 3072  }
  0x22   : > { %1127 = vsyncadd (%p1225_p7), %s193_s3, 4294964224  ;;  %s203_s4 = scalar_lea.sflag [#allocation6], %s192_s28  ;;  %s1264_s21 = scalar_lea.vmem [#allocation5], %s936_s30 }
  0x23   : > { %1129 = dma.done.wait (%p1225_p7), %s203_s4, 3072  }
  0x24   : > { %1131 = vsyncadd (%p1225_p7), %s203_s4, 4294964224  ;;  %p774_p13 = scmp.ne.s32.totalorder %s1150_s12, 0 }
  0x26   : > { %235 = sbr.rel (%p774_p13) target bundleno = 52 (0x34), region = 40 }
  0x2b   : > { %v1165_v0 = vmov 0.0  }
  0x2c   : > { %236 = vst [vmem:[#allocation7] sm:$0xff] %v1165_v0 }
  0x2d   : > { %237 = vst [vmem:[#allocation7 + $0x8] sm:$0xff] %v1165_v0 }
  0x2e   : > { %238 = vst [vmem:[#allocation7 + $0x10] sm:$0xff] %v1165_v0 }
  0x2f   : > { %239 = vst [vmem:[#allocation7 + $0x18] sm:$0xff] %v1165_v0 }
  0x30   : > { %240 = vst [vmem:[#allocation7 + $0x20] sm:$0xff] %v1165_v0 }
  0x31   : > { %241 = vst [vmem:[#allocation7 + $0x28] sm:$0xff] %v1165_v0 }
  0x32   : > { %242 = vst [vmem:[#allocation7 + $0x30] sm:$0xff] %v1165_v0 }
  0x33   : > { %243 = vst [vmem:[#allocation7 + $0x38] sm:$0xff] %v1165_v0 }
  0x34 PF: > { %v909_v1 = vld [vmem:[%s1264_s21 + $0x38] sm:$0xff]  ;;  %v908_v4 = vld [vmem:[%s1264_s21 + $0x30] sm:$0xff]  ;;  %v907_v7 = vld [vmem:[%s1264_s21 + $0x28] sm:$0xff]  ;;  %p895_p0 = scmp.ne.s32.totalorder %s1150_s12, 1 }
  0x35   : > { %v917_v2 = vld [vmem:[%s1264_s21 + $0x78] sm:$0xff]  ;;  %528 = vmatpush.bf16.msra.mxu0 %v909_v1  ;;  %v916_v5 = vld [vmem:[%s1264_s21 + $0x70] sm:$0xff]  ;;  %926 = vmatpush.bf16.msra.mxu3 %v909_v1  ;;  %v915_v8 = vld [vmem:[%s1264_s21 + $0x68] sm:$0xff] }
  0x36   : > { %v925_v3 = vld [vmem:[%s1264_s21 + $0xb8] sm:$0xff]  ;;  %557 = vmatpush.bf16.msra.mxu1 %v917_v2  ;;  %v924_v6 = vld [vmem:[%s1264_s21 + $0xb0] sm:$0xff]  ;;  %v923_v9 = vld [vmem:[%s1264_s21 + $0xa8] sm:$0xff] }
  0x37   : > { %586 = vmatpush.bf16.msra.mxu2 %v925_v3  ;;  %v906_v10 = vld [vmem:[%s1264_s21 + $0x20] sm:$0xff]  ;;  %v905_v13 = vld [vmem:[%s1264_s21 + $0x18] sm:$0xff]  ;;  %v904_v16 = vld [vmem:[%s1264_s21 + $0x10] sm:$0xff] }
  0x38   : > { %v914_v11 = vld [vmem:[%s1264_s21 + $0x60] sm:$0xff]  ;;  %v913_v14 = vld [vmem:[%s1264_s21 + $0x58] sm:$0xff]  ;;  %v912_v17 = vld [vmem:[%s1264_s21 + $0x50] sm:$0xff] }
  0x39   : > { %529 = vmatpush.bf16.msra.mxu0 %v908_v4  ;;  %927 = vmatpush.bf16.msra.mxu3 %v908_v4  ;;  %v922_v12 = vld [vmem:[%s1264_s21 + $0xa0] sm:$0xff]  ;;  %v921_v15 = vld [vmem:[%s1264_s21 + $0x98] sm:$0xff]  ;;  %v920_v18 = vld [vmem:[%s1264_s21 + $0x90] sm:$0xff] }
  0x3a   : > { %558 = vmatpush.bf16.msra.mxu1 %v916_v5  ;;  %v252_v19 = vld [vmem:[%s1258_s23] sm:$0xff]  ;;  %v255_v20 = vld [vmem:[%s1258_s23 + $0x18] sm:$0xff]  ;;  %v253_v21 = vld [vmem:[%s1258_s23 + $0x8] sm:$0xff] }
  0x3b   : > { %587 = vmatpush.bf16.msra.mxu2 %v924_v6  ;;  %v256_v22 = vld [vmem:[%s1258_s23 + $0x20] sm:$0xff]  ;;  %v254_v23 = vld [vmem:[%s1258_s23 + $0x10] sm:$0xff]  ;;  %v257_v24 = vld [vmem:[%s1258_s23 + $0x28] sm:$0xff]  ;;  %v775_v27 = vadd.f32 -128.0, %v252_v19  ;;  %v778_v28 = vadd.f32 -128.0, %v255_v20  ;;  %v776_v29 = vadd.f32 -128.0, %v253_v21 }
  0x3c   : > { %v258_v25 = vld [vmem:[%s1258_s23 + $0x30] sm:$0xff]  ;;  %v261_v26 = vld [vmem:[%s1258_s23 + $0x48] sm:$0xff]  ;;  %v779_v30 = vadd.f32 -128.0, %v256_v22  ;;  %v777_v33 = vadd.f32 -128.0, %v254_v23  ;;  %v780_v34 = vadd.f32 -128.0, %v257_v24  ;;  %v902_v42 = vld [vmem:[%s1264_s21] sm:$0xff] }
  0x3d   : > { %530 = vmatpush.bf16.msra.mxu0 %v907_v7  ;;  %928 = vmatpush.bf16.msra.mxu3 %v907_v7  ;;  %v903_v31 = vld [vmem:[%s1264_s21 + $0x8] sm:$0xff]  ;;  %v781_v35 = vadd.f32 -128.0, %v258_v25  ;;  %v784_v36 = vadd.f32 -128.0, %v261_v26  ;;  %v300_v38 = vmul.f32 0.0078125, %v775_v27  ;;  %v303_v39 = vmul.f32 0.0078125, %v778_v28  ;;  %v910_v43 = vld [vmem:[%s1264_s21 + $0x40] sm:$0xff] }
  0x3e   : > { %559 = vmatpush.bf16.msra.mxu1 %v915_v8  ;;  %v911_v32 = vld [vmem:[%s1264_s21 + $0x48] sm:$0xff]  ;;  %v301_v40 = vmul.f32 0.0078125, %v776_v29  ;;  %v304_v41 = vmul.f32 0.0078125, %v779_v30  ;;  %v302_v44 = vmul.f32 0.0078125, %v777_v33  ;;  %v305_v45 = vmul.f32 0.0078125, %v780_v34  ;;  %v918_v48 = vld [vmem:[%s1264_s21 + $0x80] sm:$0xff] }
  0x3f   : > { %588 = vmatpush.bf16.msra.mxu2 %v923_v9  ;;  %v919_v37 = vld [vmem:[%s1264_s21 + $0x88] sm:$0xff]  ;;  %v306_v46 = vmul.f32 0.0078125, %v781_v35  ;;  %v309_v47 = vmul.f32 0.0078125, %v784_v36  ;;  %v324_v49 = vpack.c.bf16 %v303_v39, %v300_v38  ;;  %v259_v53 = vld [vmem:[%s1258_s23 + $0x38] sm:$0xff]  ;;  %v262_v54 = vld [vmem:[%s1258_s23 + $0x50] sm:$0xff] }
  0x40   : > { %v325_v50 = vpack.c.bf16 %v304_v41, %v301_v40  ;;  %v326_v51 = vpack.c.bf16 %v305_v45, %v302_v44  ;;  %v260_v55 = vld [vmem:[%s1258_s23 + $0x40] sm:$0xff]  ;;  %v263_v56 = vld [vmem:[%s1258_s23 + $0x58] sm:$0xff]  ;;  %v782_v59 = vadd.f32 -128.0, %v259_v53  ;;  %v785_v60 = vadd.f32 -128.0, %v262_v54 }
  0x41   : > { %531 = vmatpush.bf16.msra.mxu0 %v906_v10  ;;  %929 = vmatpush.bf16.msra.mxu3 %v906_v10  ;;  %v327_v52 = vpack.c.bf16 %v309_v47, %v306_v46  ;;  %v264_v57 = vld [vmem:[%s1258_s23 + $0x60] sm:$0xff]  ;;  %v267_v58 = vld [vmem:[%s1258_s23 + $0x78] sm:$0xff]  ;;  %v783_v61 = vadd.f32 -128.0, %v260_v55  ;;  %v786_v62 = vadd.f32 -128.0, %v263_v56  ;;  %v265_v10 = vld [vmem:[%s1258_s23 + $0x68] sm:$0xff] }
  0x42   : > { %560 = vmatpush.bf16.msra.mxu1 %v914_v11  ;;  %v787_v63 = vadd.f32 -128.0, %v264_v57  ;;  %v790_v0 = vadd.f32 -128.0, %v267_v58  ;;  %v307_v1 = vmul.f32 0.0078125, %v782_v59  ;;  %v310_v2 = vmul.f32 0.0078125, %v785_v60  ;;  %v268_v11 = vld [vmem:[%s1258_s23 + $0x80] sm:$0xff]  ;;  %v275_v34 = vld [vmem:[%s1258_s23 + $0xb8] sm:$0xff] }
  0x43   : > { %589 = vmatpush.bf16.msra.mxu2 %v922_v12  ;;  %v308_v3 = vmul.f32 0.0078125, %v783_v61  ;;  %v311_v4 = vmul.f32 0.0078125, %v786_v62  ;;  %v266_v12 = vld [vmem:[%s1258_s23 + $0x70] sm:$0xff]  ;;  %v272_v33 = vld [vmem:[%s1258_s23 + $0xa0] sm:$0xff]  ;;  %v798_v38 = vadd.f32 -128.0, %v275_v34  ;;  %v245_v56 = vld [vmem:[#allocation7 + $0x8] sm:$0xff] }
  0x44   : > { %v312_v5 = vmul.f32 0.0078125, %v787_v63  ;;  %v315_v6 = vmul.f32 0.0078125, %v790_v0  ;;  %v328_v7 = vpack.c.bf16 %v310_v2, %v307_v1  ;;  %v246_v63 = vld [vmem:[#allocation7 + $0x10] sm:$0xff] }
  0x45   : > { %532 = vmatpush.bf16.msra.mxu0 %v905_v13  ;;  %930 = vmatpush.bf16.msra.mxu3 %v905_v13  ;;  %v329_v8 = vpack.c.bf16 %v311_v4, %v308_v3  ;;  %v269_v13 = vld [vmem:[%s1258_s23 + $0x88] sm:$0xff] }
  0x46   : > { %561 = vmatpush.bf16.msra.mxu1 %v913_v14  ;;  %v330_v9 = vpack.c.bf16 %v315_v6, %v312_v5  ;;  %v270_v14 = vld [vmem:[%s1258_s23 + $0x90] sm:$0xff]  ;;  %v792_v19 = vadd.f32 -128.0, %v269_v13  ;;  %v247_v6 = vld [vmem:[#allocation7 + $0x18] sm:$0xff] }
  0x47   : > { %590 = vmatpush.bf16.msra.mxu2 %v921_v15  ;;  %v273_v15 = vld [vmem:[%s1258_s23 + $0xa8] sm:$0xff]  ;;  %v793_v20 = vadd.f32 -128.0, %v270_v14 }
  0x48   : > { %v796_v21 = vadd.f32 -128.0, %v273_v15  ;;  %v317_v25 = vmul.f32 0.0078125, %v792_v19  ;;  %v249_v19 = vld [vmem:[#allocation7 + $0x28] sm:$0xff] }
  0x49   : > { %533 = vmatpush.bf16.msra.mxu0 %v904_v16  ;;  %931 = vmatpush.bf16.msra.mxu3 %v904_v16  ;;  %v788_v16 = vadd.f32 -128.0, %v265_v10  ;;  %v318_v26 = vmul.f32 0.0078125, %v793_v20 }
  0x4a   : > { %562 = vmatpush.bf16.msra.mxu1 %v912_v17  ;;  %v791_v17 = vadd.f32 -128.0, %v268_v11  ;;  %v321_v27 = vmul.f32 0.0078125, %v796_v21 }
  0x4b   : > { %591 = vmatpush.bf16.msra.mxu2 %v920_v18  ;;  %v789_v18 = vadd.f32 -128.0, %v266_v12  ;;  %v313_v22 = vmul.f32 0.0078125, %v788_v16  ;;  %v248_v12 = vld [vmem:[#allocation7 + $0x20] sm:$0xff] }
  0x4c   : > { %v316_v23 = vmul.f32 0.0078125, %v791_v17  ;;  %v333_v30 = vpack.c.bf16 %v321_v27, %v318_v26  ;;  %v250_v26 = vld [vmem:[#allocation7 + $0x30] sm:$0xff] }
  0x4d   : > { %534 = vmatpush.bf16.msra.mxu0 %v903_v31  ;;  %932 = vmatpush.bf16.msra.mxu3 %v903_v31  ;;  %v314_v24 = vmul.f32 0.0078125, %v789_v18  ;;  %v271_v31 = vld [vmem:[%s1258_s23 + $0x98] sm:$0xff] }
  0x4e   : > { %563 = vmatpush.bf16.msra.mxu1 %v911_v32  ;;  %v331_v28 = vpack.c.bf16 %v316_v23, %v313_v22  ;;  %v274_v32 = vld [vmem:[%s1258_s23 + $0xb0] sm:$0xff]  ;;  %v794_v35 = vadd.f32 -128.0, %v271_v31 }
  0x4f   : > { %592 = vmatpush.bf16.msra.mxu2 %v919_v37  ;;  %v332_v29 = vpack.c.bf16 %v317_v25, %v314_v24  ;;  %v797_v36 = vadd.f32 -128.0, %v274_v32  ;;  %v795_v37 = vadd.f32 -128.0, %v272_v33  ;;  %v251_v33 = vld [vmem:[#allocation7 + $0x38] sm:$0xff] }
  0x50   : > { %v319_v39 = vmul.f32 0.0078125, %v794_v35 }
  0x51   : > { %535 = vmatpush.bf16.msra.mxu0 %v902_v42  ;;  %933 = vmatpush.bf16.msra.mxu3 %v902_v42  ;;  %v322_v40 = vmul.f32 0.0078125, %v797_v36  ;;  %v320_v41 = vmul.f32 0.0078125, %v795_v37  ;;  %v323_v42 = vmul.f32 0.0078125, %v798_v38 }
  0x52   : > { %564 = vmatpush.bf16.msra.mxu1 %v910_v43 }
  0x53   : > { %593 = vmatpush.bf16.msra.mxu2 %v918_v48  ;;  %v334_v43 = vpack.c.bf16 %v322_v40, %v319_v39  ;;  %v335_v44 = vpack.c.bf16 %v323_v42, %v320_v41  ;;  %v244_v48 = vld [vmem:[#allocation7] sm:$0xff] }
  0x54   : > { %536 = vmatmul.bf16.vlgmr.msra.gmra.mxu0 %v324_v49  ;;  %541 = vmatmul.bf16.vlgmr.msra.gmra.mxu3 %v327_v52 }
  0x55   : > { %565 = vmatmul.bf16.vlgmr.msra.gmra.mxu1 %v325_v50 }
  0x56   : > { %594 = vmatmul.bf16.vlgmr.msra.gmra.mxu2 %v326_v51 }
  0x64   : > { %546 = vmatmul.bf16.gmra.mxu3 %v330_v9 }
  0x65   : > { %570 = vmatmul.bf16.gmra.mxu1 %v328_v7 }
  0x66   : > { %599 = vmatmul.bf16.gmra.mxu2 %v329_v8 }
  0x74   : > { %551 = vmatmul.bf16.gmra.mxu3 %v333_v30 }
  0x75   : > { %575 = vmatmul.bf16.gmra.mxu1 %v331_v28 }
  0x76   : > { %604 = vmatmul.bf16.gmra.mxu2 %v332_v29 }
  0x85   : > { %580 = vmatmul.bf16.gmra.mxu1 %v334_v43 }
  0x86   : > { %609 = vmatmul.bf16.gmra.mxu2 %v335_v44 }
  0xd1   : > { %v537_v46 = vpop.f32.mrf.mxu0 }
  0xd2   : > { %v566_v45 = vpop.f32.mrf.mxu1 }
  0xd3   : > { %v567_v47 = vadd.f32 %v566_v45, %v537_v46 }
  0xd7   : > { %v542_v54 = vpop.f32.mrf.mxu3 }
  0xd9   : > { %v595_v49 = vpop.f32.mrf.mxu2  ;;  %v539_v53 = vpop.f32.mrf.mxu0 }
  0xda   : > { %v596_v50 = vadd.f32 %v595_v49, %v567_v47  ;;  %v568_v51 = vpop.f32.mrf.mxu1 }
  0xdb   : > { %v569_v55 = vadd.f32 %v568_v51, %v539_v53 }
  0xdc   : > { %v615_v52 = vadd.f32 %v596_v50, %v244_v48 }
  0xde   : > { %623 = vst [vmem:[#allocation7] sm:$0xff] %v615_v52 }
  0xdf   : > { %v544_v62 = vpop.f32.mrf.mxu3 }
  0xe1   : > { %v597_v57 = vpop.f32.mrf.mxu2 }
  0xe2   : > { %v598_v58 = vadd.f32 %v597_v57, %v569_v55  ;;  %v571_v59 = vpop.f32.mrf.mxu1 }
  0xe3   : > { %v572_v61 = vadd.f32 %v571_v59, %v542_v54 }
  0xe4   : > { %v616_v60 = vadd.f32 %v598_v58, %v245_v56 }
  0xe6   : > { %624 = vst [vmem:[#allocation7 + $0x8] sm:$0xff] %v616_v60 }
  0xe7   : > { %v547_v5 = vpop.f32.mrf.mxu3 }
  0xe9   : > { %v600_v0 = vpop.f32.mrf.mxu2 }
  0xea   : > { %v601_v1 = vadd.f32 %v600_v0, %v572_v61  ;;  %v573_v2 = vpop.f32.mrf.mxu1 }
  0xeb   : > { %v574_v4 = vadd.f32 %v573_v2, %v544_v62 }
  0xec   : > { %v617_v3 = vadd.f32 %v601_v1, %v246_v63 }
  0xee   : > { %625 = vst [vmem:[#allocation7 + $0x10] sm:$0xff] %v617_v3 }
  0xef   : > { %v549_v16 = vpop.f32.mrf.mxu3 }
  0xf1   : > { %v602_v7 = vpop.f32.mrf.mxu2 }
  0xf2   : > { %v603_v8 = vadd.f32 %v602_v7, %v574_v4  ;;  %v576_v9 = vpop.f32.mrf.mxu1 }
  0xf3   : > { %v577_v11 = vadd.f32 %v576_v9, %v547_v5 }
  0xf4   : > { %v618_v10 = vadd.f32 %v603_v8, %v247_v6 }
  0xf6   : > { %626 = vst [vmem:[#allocation7 + $0x18] sm:$0xff] %v618_v10 }
  0xf7   : > { %v552_v24 = vpop.f32.mrf.mxu3 }
  0xf9   : > { %v605_v13 = vpop.f32.mrf.mxu2 }
  0xfa   : > { %v606_v14 = vadd.f32 %v605_v13, %v577_v11  ;;  %v578_v15 = vpop.f32.mrf.mxu1 }
  0xfb   : > { %v579_v18 = vadd.f32 %v578_v15, %v549_v16 }
  0xfc   : > { %v619_v17 = vadd.f32 %v606_v14, %v248_v12 }
  0xfe   : > { %627 = vst [vmem:[#allocation7 + $0x20] sm:$0xff] %v619_v17 }
  0xff   : > { %v554_v31 = vpop.f32.mrf.mxu3 }
 0x101   : > { %v607_v20 = vpop.f32.mrf.mxu2 }
 0x102   : > { %v608_v21 = vadd.f32 %v607_v20, %v579_v18  ;;  %v581_v22 = vpop.f32.mrf.mxu1 }
 0x103   : > { %v582_v25 = vadd.f32 %v581_v22, %v552_v24 }
 0x104   : > { %v620_v23 = vadd.f32 %v608_v21, %v249_v19 }
 0x106   : > { %628 = vst [vmem:[#allocation7 + $0x28] sm:$0xff] %v620_v23 }
 0x109   : > { %v610_v27 = vpop.f32.mrf.mxu2 }
 0x10a   : > { %v611_v28 = vadd.f32 %v610_v27, %v582_v25  ;;  %v583_v30 = vpop.f32.mrf.mxu1 }
 0x10b   : > { %v584_v32 = vadd.f32 %v583_v30, %v554_v31 }
 0x10c   : > { %v621_v29 = vadd.f32 %v611_v28, %v250_v26 }
 0x10e   : > { %629 = vst [vmem:[#allocation7 + $0x30] sm:$0xff] %v621_v29 }
 0x111   : > { %v612_v34 = vpop.f32.mrf.mxu2 }
 0x112   : > { %v613_v35 = vadd.f32 %v612_v34, %v584_v32  ;;  %634 = sbr.rel (%p895_p0) target bundleno = 290 (0x122), region = 44 }
 0x114   : > { %v622_v36 = vadd.f32 %v613_v35, %v251_v33 }
 0x116   : > { %630 = vst [vmem:[#allocation7 + $0x38] sm:$0xff] %v622_v36 }
 0x117   : > { %v635_v37 = vld [vmem:[#allocation7] sm:$0xff]  ;;  %v636_v38 = vld [vmem:[#allocation7 + $0x8] sm:$0xff]  ;;  %v637_v39 = vld [vmem:[#allocation7 + $0x10] sm:$0xff] }
 0x118   : > { %v643_v40 = vmax.f32 %v635_v37, 0.0  ;;  %v644_v41 = vmax.f32 %v636_v38, 0.0  ;;  %v645_v42 = vmax.f32 %v637_v39, 0.0  ;;  %v638_v43 = vld [vmem:[#allocation7 + $0x18] sm:$0xff]  ;;  %v639_v44 = vld [vmem:[#allocation7 + $0x20] sm:$0xff]  ;;  %v640_v45 = vld [vmem:[#allocation7 + $0x28] sm:$0xff] }
 0x119   : > { %v646_v46 = vmax.f32 %v638_v43, 0.0  ;;  %v641_v47 = vld [vmem:[#allocation7 + $0x30] sm:$0xff]  ;;  %v647_v48 = vmax.f32 %v639_v44, 0.0  ;;  %v648_v50 = vmax.f32 %v640_v45, 0.0 }
 0x11a   : > { %651 = vst [vmem:[#allocation7] sm:$0xff] %v643_v40  ;;  %v649_v51 = vmax.f32 %v641_v47, 0.0 }
 0x11b   : > { %652 = vst [vmem:[#allocation7 + $0x8] sm:$0xff] %v644_v41 }
 0x11c   : > { %653 = vst [vmem:[#allocation7 + $0x10] sm:$0xff] %v645_v42 }
 0x11d   : > { %v642_v49 = vld [vmem:[#allocation7 + $0x38] sm:$0xff]  ;;  %654 = vst [vmem:[#allocation7 + $0x18] sm:$0xff] %v646_v46 }
 0x11e   : > { %v650_v52 = vmax.f32 %v642_v49, 0.0  ;;  %655 = vst [vmem:[#allocation7 + $0x20] sm:$0xff] %v647_v48 }
 0x11f   : > { %656 = vst [vmem:[#allocation7 + $0x28] sm:$0xff] %v648_v50 }
 0x120   : > { %657 = vst [vmem:[#allocation7 + $0x30] sm:$0xff] %v649_v51 }
 0x121   : > { %658 = vst [vmem:[#allocation7 + $0x38] sm:$0xff] %v650_v52 }
 0x122 PF: > { %p953_p1 = scmp.eq.s32.totalorder %s768_s15, 1  ;;  %s670_s27 = sshll.u32 %s1345_s2, 4  ;;  %s671_s27 = int_to_ptr.hbm [resolvable:$true] %s670_s27 }
 0x123   : > { %s1166_s5 = smov [#allocation7]   ;;  %s1167_s7 = smov 128  }
 0x124   : > { %s668_s6 = sshll.u32 %s1166_s5, 4  ;;  %s1168_s8 = smov 8   ;;  %s669_s6 = int_to_ptr.vmem [resolvable:$true] %s668_s6 }
 0x125   : > { %942 = dma.vmem_to_hbm [thread:$0]  (%p953_p1), %s669_s6, 1024, %s671_s27, [#allocation4], %s1167_s7, %s1167_s7, %s1168_s8  }
 0x126   : > { %1133 = dma.done.wait (%p953_p1), [#allocation4], 1024  }
 0x127   : > { %1135 = vsyncadd (%p953_p1), [#allocation4], 4294966272 }
 0x128 PF: > { %s19_s14 = sadd.s32 1, %s1158_s14   ;;  %s1348_s9 = smov %s1142_s10 }
 0x129   : > { %p16_p2 = scmp.ge.s32.totalorder %s19_s14, 4   ;;  %s1349_s10 = smov %s1146_s11 }
 0x12a   : > { %s1350_s11 = smov %s1231_s20  ;;  %s1351_s12 = smov %s1154_s13 }
 0x12b   : > { %s1352_s13 = smov %s1354_s16  ;;  %18 = sbr.rel (!%p16_p2) target bundleno = 7 (0x7), region = 87 }
 0x130   :  { %687 = vsyncpa [#allocation3], 1 }
 0x131   :  { %689 = vsyncpa [#allocation3 + $0x1], 1 }
 0x132   :  { %690 = vsyncpa [#allocation6], 1 }
 0x133   :  { %692 = vsyncpa [#allocation6 + $0x1], 1 }
 0x134   :  { %693 = vsyncpa [#allocation4], 1 }
 0x135   :  { %695 = vsyncpa [#allocation4 + $0x1], 1 }

</bundles_post_ra>
